<compile_context>
chip_gen: v7x
topology: tpu7x:2x2x1
jax: 0.10.0
libtpu: 0.0.40
codegen_flags: <defaults>
</compile_context>

<pallas_src>
import functools

import jax
import jax.numpy as jnp
from jax.experimental import pallas as pl
from jax.experimental.pallas import tpu as pltpu

IN_PLANES = 32        # cfg.MODEL.VSSM.IN_PLANES (small synthetic value)
NUM_CLASSES = 8       # num_classes (small synthetic value)
BN_EPS = 1e-5         # nn.BatchNorm1d default eps
LANE = 128
SUBLANE = 8
MAX_TS = 32 * 1024                   # cap on tile width (keeps unrolled chunk loop small)
X_STREAM_VMEM = 24 * 1024 * 1024     # budget for the two pipelined x buffers (all gens)


def _round_up(x, m):
    return ((x + m - 1) // m) * m


def _cdiv(a, b):
    return (a + b - 1) // b


# ---------------------------------------------------------------------------
# Kernel 1: streaming global-average-pool partial sums over the spatial axis.
# ---------------------------------------------------------------------------
def _pool_kernel(x_ref, psum_ref, acc_ref, *, tiles_per_core, n_tiles_total,
                 hw, ts, ragged, overhang):
    # x_ref:    (RB, TS)     one spatial tile of the flattened (B*C, H*W) input
    # psum_ref: (1, RB, 128) this core's lane-wise partial-sum output slot
    # acc_ref:  (RB, 128)    VMEM accumulator, persists across the k axis
    c = pl.program_id(0)             # core-split index ("parallel")
    k = pl.program_id(1)             # spatial tile index within this core
    tile = c * tiles_per_core + k    # global spatial tile index

    @pl.when(k == 0)
    def _init():
        acc_ref[...] = jnp.zeros_like(acc_ref)

    n_full = ts // LANE
    tail = ts % LANE                 # nonzero only in the H*W < 128 fallback

    def _accum_unmasked():
        # Pure VPU: one full-vreg add per 128-lane chunk into a
        # register-resident lane-wise partial; single unmasked acc store.
        if n_full:
            partial = acc_ref[...]
            for j in range(n_full):
                partial = partial + x_ref[:, j * LANE:(j + 1) * LANE].astype(jnp.float32)
            acc_ref[...] = partial
        if tail:
            acc_ref[:, :tail] = (acc_ref[:, :tail]
                                 + x_ref[:, n_full * LANE:].astype(jnp.float32))

    def _accum_masked():
        # Taken only by the single globally-last (ragged) spatial tile: zero
        # out the columns past H*W so OOB-read garbage never enters the sum.
        rem = hw - tile * ts
        lane_idx = jax.lax.broadcasted_iota(jnp.int32, (1, LANE), 1)
        partial = acc_ref[...]
        for j in range(n_full):
            chunk = x_ref[:, j * LANE:(j + 1) * LANE].astype(jnp.float32)
            chunk = jnp.where(lane_idx < rem - j * LANE, chunk, 0.0)
            partial = partial + chunk
        acc_ref[...] = partial

    def _accumulate():
        if ragged:
            pl.when(tile == n_tiles_total - 1)(_accum_masked)
            pl.when(tile != n_tiles_total - 1)(_accum_unmasked)
        else:
            _accum_unmasked()

    if overhang:
        # Core-split remainder tiles (index-clamped in the BlockSpec) are skipped.
        pl.when(tile < n_tiles_total)(_accumulate)
    else:
        _accumulate()

    @pl.when(k == tiles_per_core - 1)
    def _finalize():
        psum_ref[0] = acc_ref[...]   # full 128-lane unmasked store, once per core


# ---------------------------------------------------------------------------
# Kernel 2: one-shot head — projection stand-in + BatchNorm1d + classifier.
# ---------------------------------------------------------------------------
def _head_kernel(pooled_ref, wproj_ref, gamma_ref, beta_ref, wclsT_ref,
                 gfeat_ref, feat_ref, cls_ref):
    pooled = pooled_ref[...]                                           # (B, C)
    # --- backbone stand-in: GAP (done upstream) + 1x1 projection C -> P -----
    gfeat = jnp.dot(pooled, wproj_ref[...],
                    preferred_element_type=jnp.float32)                # (B, PPAD)
    gfeat_ref[...] = gfeat
    # --- self.bottleneck = nn.BatchNorm1d(in_planes), training statistics ---
    mu = jnp.mean(gfeat, axis=0, keepdims=True)
    var = jnp.mean((gfeat - mu) ** 2, axis=0, keepdims=True)           # biased
    inv_std = jax.lax.rsqrt(var + BN_EPS)
    feat = (gfeat - mu) * inv_std * gamma_ref[...] + beta_ref[...]
    feat_ref[...] = feat
    # --- self.classifier = nn.Linear(in_planes, num_classes, bias=False) ----
    cls_ref[...] = jnp.dot(feat, wclsT_ref[...],
                           preferred_element_type=jnp.float32)         # (B, NCPAD)


def build_vmamba_forward(x_nchw, wproj, gamma, beta, wcls, *, max_spatial_tile=None):
    """Training-mode forward of build_vmamba: returns (cls_score, global_feat, feat).

    x_nchw : (B, C, H, W)   input image batch (f32 or bf16 — streamed as-is)
    wproj  : (C, IN_PLANES) backbone stand-in projection
    gamma  : (1, IN_PLANES) BatchNorm1d weight
    beta   : (1, IN_PLANES) BatchNorm1d bias
    wcls   : (NUM_CLASSES, IN_PLANES) PyTorch Linear weight layout
    """
    B, C, H, W = x_nchw.shape
    HW = H * W
    RB = B * C
    P = wproj.shape[1]
    NC = wcls.shape[0]
    PPAD = _round_up(max(P, LANE), LANE)
    NCPAD = _round_up(max(NC, LANE), LANE)

    # ---- spatial tile size from a VMEM budget (>= ~1 MiB moved per step) ----
    itemsize = jnp.dtype(x_nchw.dtype).itemsize
    rb_pad = _round_up(RB, SUBLANE)
    ts = X_STREAM_VMEM // (2 * rb_pad * itemsize)
    ts = max(LANE, min(MAX_TS, (ts // LANE) * LANE))
    if max_spatial_tile is not None:
        ts = max(LANE, min(ts, (max_spatial_tile // LANE) * LANE))
    if HW < LANE:
        ts = HW                                  # single full-width block fallback
    else:
        ts = min(ts, (HW // LANE) * LANE)        # multiple of 128, never > H*W

    n_tiles_total = _cdiv(HW, ts)
    ncores = 2 if n_tiles_total >= 2 else 1      # v7x: split reduction over both TCs
    tiles_per_core = _cdiv(n_tiles_total, ncores)
    overhang = ncores * tiles_per_core > n_tiles_total
    ragged = (HW % ts) != 0

    # Free, contiguous NCHW reshape; keep native dtype (bf16 streams at half BW).
    x2d = x_nchw.reshape(RB, HW)

    if overhang:
        x_index = lambda c, k: (0, jnp.minimum(c * tiles_per_core + k,
                                               n_tiles_total - 1))
    else:
        x_index = lambda c, k: (0, c * tiles_per_core + k)

    # VMEM limit derived from the actual double-buffered tile footprint; safe
    # on v5e (16 MiB scoped default raised) and well under v7x's 64 MiB physical.
    x_buf_bytes = rb_pad * ts * itemsize
    vmem_limit = int(min(40 * 1024 * 1024,
                         max(16 * 1024 * 1024, 2 * x_buf_bytes + 4 * 1024 * 1024)))

    pool = functools.partial(_pool_kernel, tiles_per_core=tiles_per_core,
                             n_tiles_total=n_tiles_total, hw=HW, ts=ts,
                             ragged=ragged, overhang=overhang)

    psum = pl.pallas_call(
        pool,
        out_shape=jax.ShapeDtypeStruct((ncores, RB, LANE), jnp.float32),
        grid_spec=pltpu.PrefetchScalarGridSpec(
            num_scalar_prefetch=0,
            grid=(ncores, tiles_per_core),
            in_specs=[pl.BlockSpec((RB, ts), x_index)],
            out_specs=pl.BlockSpec((1, RB, LANE), lambda c, k: (c, 0, 0)),
            scratch_shapes=[pltpu.VMEM((RB, LANE), jnp.float32)],
        ),
        compiler_params=pltpu.CompilerParams(
            dimension_semantics=("parallel", "arbitrary"),
            vmem_limit_bytes=vmem_limit,
        ),
    )(x2d)

    # ---- tiny combine (a few KiB) in plain JAX: cores + lanes -> (B, C) mean ----
    # Note: raw sums accumulate in f32 and are scaled once; fine for typical H*W.
    pooled = (psum.sum(axis=(0, 2)) * (1.0 / float(HW))).reshape(B, C)

    # ---- lane-dense (multiple-of-128) parameter padding — runs once, layout glue --
    wproj_p = jnp.zeros((C, PPAD), jnp.float32).at[:, :P].set(wproj.astype(jnp.float32))
    gamma_p = jnp.zeros((1, PPAD), jnp.float32).at[:, :P].set(
        gamma.reshape(1, P).astype(jnp.float32))
    beta_p = jnp.zeros((1, PPAD), jnp.float32).at[:, :P].set(
        beta.reshape(1, P).astype(jnp.float32))
    wclsT_p = jnp.zeros((PPAD, NCPAD), jnp.float32).at[:P, :NC].set(
        wcls.T.astype(jnp.float32))

    gfeat_p, feat_p, cls_p = pl.pallas_call(
        _head_kernel,
        out_shape=(
            jax.ShapeDtypeStruct((B, PPAD), jnp.float32),    # global_feat (padded)
            jax.ShapeDtypeStruct((B, PPAD), jnp.float32),    # feat after BN (padded)
            jax.ShapeDtypeStruct((B, NCPAD), jnp.float32),   # cls_score (padded)
        ),
    )(pooled, wproj_p, gamma_p, beta_p, wclsT_p)

    cls_score = cls_p[:, :NC]
    global_feat = gfeat_p[:, :P]
    feat = feat_p[:, :P]
    return cls_score, global_feat, feat


def _reference_forward(x, wproj, gamma, beta, wcls):
    Bq, Cq, Hq, Wq = x.shape
    pooled = jnp.mean(x.reshape(Bq, Cq, Hq * Wq).astype(jnp.float32), axis=-1)
    gfeat = pooled @ wproj
    mu = jnp.mean(gfeat, axis=0, keepdims=True)
    var = jnp.mean((gfeat - mu) ** 2, axis=0, keepdims=True)
    feat = (gfeat - mu) * jax.lax.rsqrt(var + BN_EPS) * gamma + beta
    cls = feat @ wcls.T
    return cls, gfeat, feat


if __name__ == "__main__":
    key = jax.random.PRNGKey(0)
    kx, kp, kc, kx2 = jax.random.split(key, 4)

    B, C, H, W = 2, 4, 16, 16
    x = jax.random.normal(kx, (B, C, H, W), dtype=jnp.float32)

    # Backbone stand-in projection: kaiming-normal-like (fan_in = C).
    wproj = jax.random.normal(kp, (C, IN_PLANES), dtype=jnp.float32) * jnp.sqrt(2.0 / C)
    # BatchNorm1d params: weights_init_kaiming -> weight=1, bias=0 (frozen).
    gamma = jnp.ones((1, IN_PLANES), dtype=jnp.float32)
    beta = jnp.zeros((1, IN_PLANES), dtype=jnp.float32)
    # Classifier: weights_init_classifier -> normal(std=0.001), no bias.
    wcls = jax.random.normal(kc, (NUM_CLASSES, IN_PLANES), dtype=jnp.float32) * 0.001

    # max_spatial_tile=128 forces a (2 cores x 1 tile) grid on this tiny input so
    # the core-split / pipelined path is exercised; production inputs get
    # budget-derived multi-MiB tiles automatically.
    cls_score, global_feat, feat = build_vmamba_forward(
        x, wproj, gamma, beta, wcls, max_spatial_tile=128)
    jax.block_until_ready((cls_score, global_feat, feat))

    assert cls_score.shape == (B, NUM_CLASSES)
    assert global_feat.shape == (B, IN_PLANES)
    assert feat.shape == (B, IN_PLANES)

    cls_ref, gfeat_ref, feat_ref = _reference_forward(x, wproj, gamma, beta, wcls)
    assert jnp.allclose(global_feat, gfeat_ref, atol=1e-4, rtol=1e-4)
    assert jnp.allclose(feat, feat_ref, atol=1e-4, rtol=1e-4)
    assert jnp.allclose(cls_score, cls_ref, atol=1e-4, rtol=1e-4)

    # Second check: H*W = 320 with 128-wide tiles exercises the ragged last
    # tile (masked partial sum) and the clamped/skipped overhang tile of the
    # two-core split — no wrapper-side padding of x anywhere.
    x2 = jax.random.normal(kx2, (B, C, 20, 16), dtype=jnp.float32)
    cls2, gfeat2, feat2 = build_vmamba_forward(
        x2, wproj, gamma, beta, wcls, max_spatial_tile=128)
    jax.block_until_ready((cls2, gfeat2, feat2))
    cls2_r, gfeat2_r, feat2_r = _reference_forward(x2, wproj, gamma, beta, wcls)
    assert jnp.allclose(gfeat2, gfeat2_r, atol=1e-4, rtol=1e-4)
    assert jnp.allclose(feat2, feat2_r, atol=1e-4, rtol=1e-4)
    assert jnp.allclose(cls2, cls2_r, atol=1e-4, rtol=1e-4)

    print("KERNEL_OK")
</pallas_src>

<mosaic_0001>
module attributes {stable_mosaic.version = 11 : i64} {
  func.func @_pool_kernel(%arg0: i32, %arg1: i32, %arg2: memref<8x128xf32, #tpu.memory_space<vmem>>, %arg3: memref<1x8x128xf32, #tpu.memory_space<vmem>>, %arg4: memref<8x128xf32, #tpu.memory_space<vmem>>) attributes {dimension_semantics = [#tpu.dimension_semantics<parallel>, #tpu.dimension_semantics<arbitrary>], iteration_bounds = array<i64: 2, 1>, scalar_prefetch = 0 : i64, scratch_operands = 1 : i64, tpu.core_type = #tpu.core_type<tc>, window_params = [{transform_indices = @transform_0, window_bounds = array<i64: 8, 128>}, {transform_indices = @transform_1, window_bounds = array<i64: 1, 8, 128>}]} {
    %c0_i32 = arith.constant 0 : i32
    %0 = arith.cmpi eq, %arg1, %c0_i32 : i32
    %1 = arith.extui %0 : i1 to i32
    %c0_i32_0 = arith.constant 0 : i32
    %2 = arith.cmpi ne, %1, %c0_i32_0 : i32
    scf.if %2 {
      %cst = arith.constant 0.000000e+00 : f32
      %10 = vector.broadcast %cst : f32 to vector<8x128xf32>
      %c0_8 = arith.constant 0 : index
      %c0_9 = arith.constant 0 : index
      %11 = vector.load %arg4[%c0_8, %c0_9] : memref<8x128xf32, #tpu.memory_space<vmem>>, vector<8x128xf32>
      tpu.vector_store %arg4[%c0_8, %c0_9], %10 {strides = array<i32>} : memref<8x128xf32, #tpu.memory_space<vmem>>, vector<8x128xf32>,
    } else {
    }
    %c0 = arith.constant 0 : index
    %c0_1 = arith.constant 0 : index
    %3 = vector.load %arg4[%c0, %c0_1] : memref<8x128xf32, #tpu.memory_space<vmem>>, vector<8x128xf32>
    %c0_2 = arith.constant 0 : index
    %c0_3 = arith.constant 0 : index
    %4 = vector.load %arg2[%c0_2, %c0_3] : memref<8x128xf32, #tpu.memory_space<vmem>>, vector<8x128xf32>
    %5 = arith.addf %3, %4 : vector<8x128xf32>
    %c0_4 = arith.constant 0 : index
    %c0_5 = arith.constant 0 : index
    %6 = vector.load %arg4[%c0_4, %c0_5] : memref<8x128xf32, #tpu.memory_space<vmem>>, vector<8x128xf32>
    tpu.vector_store %arg4[%c0_4, %c0_5], %5 {strides = array<i32>} : memref<8x128xf32, #tpu.memory_space<vmem>>, vector<8x128xf32>,
    %c0_i32_6 = arith.constant 0 : i32
    %7 = arith.cmpi eq, %arg1, %c0_i32_6 : i32
    %8 = arith.extui %7 : i1 to i32
    %c0_i32_7 = arith.constant 0 : i32
    %9 = arith.cmpi ne, %8, %c0_i32_7 : i32
    scf.if %9 {
      %c0_8 = arith.constant 0 : index
      %c0_9 = arith.constant 0 : index
      %10 = vector.load %arg4[%c0_8, %c0_9] : memref<8x128xf32, #tpu.memory_space<vmem>>, vector<8x128xf32>
      %c0_10 = arith.constant 0 : index
      %c0_11 = arith.constant 0 : index
      %c0_12 = arith.constant 0 : index
      %11 = vector.load %arg3[%c0_10, %c0_11, %c0_12] : memref<1x8x128xf32, #tpu.memory_space<vmem>>, vector<1x8x128xf32>
      %12 = vector.shape_cast %11 : vector<1x8x128xf32> to vector<8x128xf32>
      %13 = vector.shape_cast %10 : vector<8x128xf32> to vector<1x8x128xf32>
      tpu.vector_store %arg3[%c0_10, %c0_11, %c0_12], %13 {strides = array<i32>} : memref<1x8x128xf32, #tpu.memory_space<vmem>>, vector<1x8x128xf32>,
    } else {
    }
    return
  }
  func.func @transform_0(%arg0: i32, %arg1: i32) -> (i32, i32) {
    %c1_i32 = arith.constant 1 : i32
    %0 = arith.muli %arg0, %c1_i32 : i32
    %1 = arith.addi %0, %arg1 : i32
    %c0_i32 = arith.constant 0 : i32
    %c0_i32_0 = arith.constant 0 : i32
    return %c0_i32, %1 : i32, i32
  }
  func.func @transform_1(%arg0: i32, %arg1: i32) -> (i32, i32, i32) {
    %c0_i32 = arith.constant 0 : i32
    %c0_i32_0 = arith.constant 0 : i32
    %c0_i32_1 = arith.constant 0 : i32
    return %arg0, %c0_i32, %c0_i32_0 : i32, i32, i32
  }
}

</mosaic_0001>

<bundles_post_ra>
// kernel: tpu_custom_call.1
= control target key start
LH: loop header
LB: loop body
LE: loop exit
PB: predicated region body
PF: predicated region fallthrough
CT: control target
= control target key end

     0   :  { %6 = vsyncpa [#allocation4], 0  ;;  %s628_s0 = inlined_call_operand.hbm [shape: f32[8,256], index: 0, kind: input, shape index: {}]   ;;  %s629_s1 = inlined_call_operand.hbm [shape: f32[2,8,128], index: 1, kind: output, shape index: {}]  }
   0x1   :  { %8 = vsyncpa [#allocation4 + $0x1], 0 }
   0x2   :  { %9 = vsyncpa [#allocation5], 0 }
   0x3   :  { %11 = vsyncpa [#allocation5 + $0x1], 0  ;;  %s456_s6 = smov 0   ;;  %s458_s7 = smov 0  }
   0x4   :  { %s460_s8 = smov 0   ;;  %s462_s9 = smov 0  }
   0x5   :  { %s464_s10 = smov 0   ;;  %s466_s11 = smov 0  }
   0x6 LB: > { %s255_s12 = sadd.s32 4294967295, %s442_s11   ;;  %s256_s13 = sadd.s32 4294967294, %s442_s11   ;;  %s442_s11 = sphi %s466_s11, %s17_s11   ;;  %s438_s10 = sphi %s464_s10, %s645_s10   ;;  %s434_s9 = sphi %s462_s9, %s644_s9   ;;  %s430_s8 = sphi %s460_s8, %s643_s8   ;;  %s426_s7 = sphi %s458_s7, %s642_s7   ;;  %s422_s6 = sphi %s456_s6, %s641_s6  }
   0x7   : > { %s29_s14 = sadd.s32 1, %s438_s10  ;;  %s38_s15 = sadd.s32 1, %s430_s8 }
   0x8   : > { %p31_p0 = scmp.ge.s32.totalorder %s29_s14, 2  ;;  %p45_p1 = scmp.ne.s32.totalorder %s430_s8, %s426_s7 }
   0x9   : > { %p46_p2 = scmp.eq.s32.totalorder %s442_s11, 0  ;;  %p51_p3 = scmp.ne.s32.totalorder %s426_s7, %s422_s6 }
   0xa   : > { %s647_s14 = smov (%p31_p0, %s29_s14), 0  ;;  %p52_p5 = scmp.eq.s32.totalorder %s255_s12, 0 }
   0xb   : > { %p497_p4 = por %p46_p2, %p45_p1  ;;  %s35_s17 = ssub.s32 %s438_s10, %s647_s14 }
   0xc   : > { %p75_p6 = scmp.eq.s32.totalorder %s255_s12, 1  ;;  %p36_p7 = scmp.eq.s32.totalorder %s35_s17, 0 }
   0xd   : > { %p503_p8 = por %p52_p5, %p51_p3  ;;  %p81_p10 = scmp.eq.s32.totalorder %s256_s13, 1 }
   0xe   : > { %p507_p9 = por %p75_p6, %p45_p1  ;;  %p280_p13 = scmp.lt.s32.totalorder %s442_s11, 2 }
   0xf   : > { %s512_s20 = scalar_select %p36_p7, %s430_s8, %s38_s15  }
  0x10   : > { %s633_s19 = scalar_select %p507_p9, 1, 0 }
  0x11   : > { %p514_p11 = por %p81_p10, %p51_p3  ;;  %s101_s22 = sand.u32 1, %s430_s8  }
  0x12   : > { %s259_s23 = sshll.u32 %s101_s22, 3  ;;  %s260_s24 = sshll.u32 %s438_s10, 7 }
  0x13   : > { %s634_s21 = scalar_select %p514_p11, 1, 0 }
  0x14   : > { %s525_s27 = scalar_lea.hbm %s628_s0, %s260_s24  ;;  %s105_s28 = scalar_lea.vmem [#allocation3], %s259_s23 }
  0x15   : > { %s113_s29 = sshll.u32 %s105_s28, 4  ;;  %p531_p0 = pnand %p280_p13, %p497_p4  ;;  %s527_s29 = int_to_ptr.vmem [resolvable:$true] %s113_s29 }
  0x16   : > { %s102_s2 = scalar_lea.sflag [#allocation4], %s101_s22  ;;  %s330_s3 = scalar_lea.hbm %s525_s27, 128 }
  0x17   : > { %p331_p3 = scmp.ne.s32.totalorder %s525_s27, %s330_s3  ;;  %p332_p5 = pneg %p531_p0 }
  0x18   : > { %s335_s12 = scalar_lea.hbm %s628_s0, 256  ;;  %p336_p4 = scmp.lt.u32.totalorder %s525_s27, %s628_s0 }
  0x19   : > { %p333_p6 = pnand %p332_p5, %p331_p3  ;;  %p337_p10 = scmp.lt.u32.totalorder %s335_s12, %s330_s3 }
  0x1a   : > { %p339_p12 = scmp.lt.u32.totalorder %s330_s3, %s525_s27 }
  0x1b   : > { %p334_p7 = pneg %p333_p6  ;;  %p338_p13 = por %p337_p10, %p336_p4 }
  0x1d   : > { %p340_p1 = por %p339_p12, %p338_p13 }
  0x1f   : > { %p341_p2 = pnand %p340_p1, %p334_p7 }
  0x21   : > { %344 = shalt.err (!%p341_p2)
}
  0x22   : > { %s345_s16 = scalar_lea.vmem %s527_s29, 128  ;;  %s444_s17 = smov [#allocation3]  }
  0x23   : > { %p346_p3 = scmp.ne.s32.totalorder %s527_s29, %s345_s16  ;;  %s350_s22 = sshll.u32 %s444_s17, 4  ;;  %s351_s22 = int_to_ptr.vmem [resolvable:$false] %s350_s22 }
  0x24   : > { %s352_s23 = scalar_lea.vmem %s351_s22, 256  ;;  %p353_p9 = scmp.lt.s32.totalorder %s527_s29, %s351_s22 }
  0x25   : > { %p348_p6 = pnand %p346_p3, %p332_p5  ;;  %p354_p4 = scmp.lt.s32.totalorder %s352_s23, %s345_s16 }
  0x27   : > { %p349_p11 = pneg %p348_p6  ;;  %p355_p10 = por %p354_p4, %p353_p9 }
  0x29   : > { %p356_p12 = pnand %p355_p10, %p349_p11 }
  0x2b   : > { %359 = shalt.err (!%p356_p12)
}
  0x2c   : > { %275 = dma.hbm_to_vmem [thread:$0]  (!%p531_p0), %s525_s27, 128, %s527_s29, %s102_s2  }
  0x2d   : > { %p636_p1 = scmp.lt.s32.totalorder %s442_s11, 3  ;;  %p637_p2 = scmp.ge.s32.totalorder %s442_s11, 1 }
  0x2f   : > { %p119_p5 = pnand %p637_p2, %p636_p1 }
  0x30   : > { %s567_s24 = sand.u32 (!%p119_p5), 1, %s426_s7  }
  0x31   : > { %122 = sbr.rel (%p119_p5) target bundleno = 83 (0x53), region = 24  ;;  %s262_s25 = sshll.u32 (!%p119_p5), %s567_s24, 3 }
  0x32   : > { %s125_s26 = scalar_lea.sflag (!%p119_p5), [#allocation4], %s567_s24  ;;  %s128_s28 = scalar_lea.vmem (!%p119_p5), [#allocation3], %s262_s25 }
  0x38   : > { %413 = dma.done.wait (%p503_p8), %s125_s26, 128  }
  0x39   : > { %415 = vsyncadd (%p503_p8), %s125_s26, 4294967168  ;;  %s146_s27 = scalar_lea.vmem [#allocation6], %s262_s25  ;;  %s265_s30 = sshll.u32 %s434_s9, 7  ;;  %v154_v0 = vld [vmem:[%s128_s28] sm:$0xff] }
  0x3a   : > { %s176_s29 = sshll.u32 %s146_s27, 4  ;;  %s581_s4 = scalar_lea.hbm %s629_s1, %s265_s30  ;;  %161 = vst [vmem:[%s146_s27] sm:$0xff] %v154_v0  ;;  %s576_s29 = int_to_ptr.vmem [resolvable:$true] %s176_s29 }
  0x3b   : > { %s163_s18 = scalar_lea.sflag [#allocation5], %s567_s24  ;;  %s360_s5 = scalar_lea.vmem %s576_s29, 128 }
  0x3c   : > { %p361_p8 = scmp.ne.s32.totalorder %s576_s29, %s360_s5  ;;  %p638_p9 = scmp.ne.s32.totalorder %s633_s19, 0 }
  0x3d   : > { %s445_s12 = smov [#allocation6]  }
  0x3e   : > { %p362_p11 = pnand %p361_p8, %p638_p9  ;;  %s364_s9 = sshll.u32 %s445_s12, 4  ;;  %s365_s9 = int_to_ptr.vmem [resolvable:$false] %s364_s9 }
  0x3f   : > { %s366_s13 = scalar_lea.vmem %s365_s9, 256  ;;  %p367_p7 = scmp.lt.s32.totalorder %s576_s29, %s365_s9 }
  0x40   : > { %p363_p0 = pneg %p362_p11  ;;  %p368_p13 = scmp.lt.s32.totalorder %s366_s13, %s360_s5 }
  0x42   : > { %p369_p3 = por %p368_p13, %p367_p7 }
  0x44   : > { %p370_p6 = pnand %p369_p3, %p363_p0 }
  0x46   : > { %373 = shalt.err (!%p370_p6)
}
  0x47   : > { %s374_s15 = scalar_lea.hbm %s581_s4, 128  ;;  %s378_s22 = scalar_lea.hbm %s629_s1, 256 }
  0x48   : > { %p375_p4 = scmp.ne.s32.totalorder %s581_s4, %s374_s15  ;;  %p379_p1 = scmp.lt.u32.totalorder %s581_s4, %s629_s1 }
  0x49   : > { %p380_p2 = scmp.lt.u32.totalorder %s378_s22, %s374_s15  ;;  %p382_p8 = scmp.lt.u32.totalorder %s374_s15, %s581_s4 }
  0x4a   : > { %p376_p10 = pnand %p375_p4, %p638_p9 }
  0x4b   : > { %p381_p5 = por %p380_p2, %p379_p1 }
  0x4c   : > { %p377_p12 = pneg %p376_p10 }
  0x4d   : > { %p383_p11 = por %p382_p8, %p381_p5 }
  0x4f   : > { %p384_p0 = pnand %p383_p11, %p377_p12 }
  0x51   : > { %387 = shalt.err (!%p384_p0)
}
  0x52   : > { %270 = dma.vmem_to_hbm [thread:$0]  (%p638_p9), %s576_s29, 128, %s581_s4, %s163_s18  }
  0x53 PF: > { %s188_s25 = sand.u32 1, %s422_s6   ;;  %p639_p7 = scmp.ne.s32.totalorder %s634_s21, 0 }
  0x54   : > { %p640_p13 = scmp.ge.s32.totalorder %s442_s11, 2  ;;  %s189_s26 = scalar_lea.sflag [#allocation5], %s188_s25 }
  0x56   : > { %p277_p3 = pnand %p640_p13, %p639_p7 }
  0x58   : > { %417 = dma.done.wait (!%p277_p3), %s189_s26, 128  }
  0x59   : > { %419 = vsyncadd (!%p277_p3), %s189_s26, 4294967168  ;;  %s17_s11 = sadd.s32 1, %s442_s11   ;;  %s641_s6 = smov %s426_s7 }
  0x5a   : > { %p14_p6 = scmp.ge.s32.totalorder %s17_s11, 4   ;;  %s642_s7 = smov %s430_s8 }
  0x5b   : > { %s643_s8 = smov %s512_s20  ;;  %s644_s9 = smov %s438_s10 }
  0x5c   : > { %s645_s10 = smov %s647_s14  ;;  %16 = sbr.rel (!%p14_p6) target bundleno = 6 (0x6), region = 77 }
  0x63   :  { %194 = vsyncpa [#allocation4], 1 }
  0x64   :  { %196 = vsyncpa [#allocation4 + $0x1], 1 }
  0x65   :  { %197 = vsyncpa [#allocation5], 1 }
  0x66   :  { %199 = vsyncpa [#allocation5 + $0x1], 1 }

</bundles_post_ra>
